<compile_context>
chip_gen: v7x
topology: tpu7x:2x2x1
jax: 0.10.0
libtpu: 0.0.40
codegen_flags: <defaults>
</compile_context>

<pallas_src>
import functools

import jax
import jax.numpy as jnp
from jax import lax
from jax.experimental import pallas as pl
from jax.experimental.pallas import tpu as pltpu


def autopad(k, p=None, d=1):
    if d > 1:
        k = d * (k - 1) + 1
    if p is None:
        p = k // 2
    return p


def _sepconv_kernel(x_ref, taps_ref, wt_ref, b_ref, o_ref, xpad_ref,
                    *, k, d, pad, H, W, Wp):
    """Fused depthwise conv + pointwise conv (BN/bias folded) + SiLU for one batch element.

    x_ref:    (1, C1, H*W)     unpadded NCHW image, spatial flattened onto lanes
    taps_ref: (k*k, C1, 1)     per-channel depthwise taps
    wt_ref:   (C2, C1)         transposed pointwise weight with BN scale folded in
    b_ref:    (C2, 1)          folded bias (dw bias routed through pw, pw bias, BN shift)
    o_ref:    (1, C2, Ho*Wp)   output slab, lane-dense; columns >= Wo of each row are junk
    xpad_ref: (C1, flat_len)   VMEM scratch: zero-padded image, row stride Wp, flattened
    """
    C1 = x_ref.shape[1]
    C2 = o_ref.shape[1]
    L = o_ref.shape[2]                        # Ho * Wp

    # ---- in-kernel zero padding into the flat scratch (no jnp.pad HBM pass in the wrapper) ----
    xpad_ref[...] = jnp.zeros_like(xpad_ref)  # unconditional: each TC owns its scratch
    for i in range(H):
        dst = (i + pad) * Wp + pad
        xpad_ref[:, dst:dst + W] = x_ref[0, :, i * W:(i + 1) * W]

    # ---- depthwise conv: k*k lane-shifted contiguous windows accumulated on the VPU ----
    taps = taps_ref[...]                      # (k*k, C1, 1), loaded once
    acc = jnp.zeros((C1, L), jnp.float32)
    for kh in range(k):
        for kw in range(k):
            off = (kh * Wp + kw) * d
            acc = acc + xpad_ref[:, off:off + L] * taps[kh * k + kw]

    # ---- pointwise 1x1 conv (BN + both biases pre-folded), then SiLU ----
    # C1/C2 are tiny, so contract over channels with C1 exact-f32 broadcast FMAs on the VPU.
    wt = wt_ref[...]                          # (C2, C1)
    y = jnp.zeros((C2, L), jnp.float32)
    for c1 in range(C1):
        y = y + wt[:, c1:c1 + 1] * acc[c1:c1 + 1, :]
    y = y + b_ref[...]
    y = y * jax.nn.sigmoid(y)                 # SiLU on the EUP
    o_ref[0] = y                              # single lane-dense store


def separable_conv(x, params, *, k=3, s=1, p=None, d=1, eps=1e-5):
    """NCHW in, NCHW out.  Matches SeparableConv.forward with BatchNorm in eval mode."""
    if s != 1:
        # TODO(synk): stride s>1 (dw stride s then 1x1 pw stride s) not implemented in the
        # Pallas path; it needs strided-row windows which relayout badly on the lane axis.
        raise NotImplementedError("Pallas SeparableConv currently supports s == 1 only")
    # TODO(synk): BatchNorm uses eval-mode running statistics (training batch stats not modeled).
    pad = autopad(k, p, d)
    x = x.astype(jnp.float32)
    N, C1, H, W = x.shape
    C2 = params["pw_w"].shape[0]
    k_eff = d * (k - 1) + 1

    Ho = H + 2 * pad - k_eff + 1              # dw output (stride 1); 1x1 pw keeps it
    Wo = W + 2 * pad - k_eff + 1
    Wp = W + 2 * pad                          # padded row stride used by the flat layout
    L = Ho * Wp                               # per-image output slab length (junk cols >= Wo)
    flat_len = (k - 1) * d * (Wp + 1) + L     # scratch covers the furthest-shifted tap window

    # Depthwise taps -> (k*k, C1, 1) so tap t broadcasts against a (C1, L) window.
    taps = jnp.transpose(params["dw_w"].reshape(C1, k * k)).reshape(k * k, C1, 1)
    taps = taps.astype(jnp.float32)

    # Fold eval-mode BatchNorm and both conv biases into the transposed pointwise weight/bias:
    #   out = silu( wT @ depthwise(x) + b )   with wT[c2,c1] = pw_w[c2,c1]*scale[c2]
    scale = params["bn_gamma"] / jnp.sqrt(params["bn_var"] + eps)                 # (C2,)
    shift = params["bn_beta"] - params["bn_mean"] * scale                         # (C2,)
    wt = (params["pw_w"].reshape(C2, C1) * scale[:, None]).astype(jnp.float32)    # (C2, C1)
    b = (wt @ params["dw_b"].astype(jnp.float32)[:, None]
         + (params["pw_b"] * scale + shift)[:, None]).astype(jnp.float32)         # (C2, 1)

    # NCHW stays NCHW: flattening H*W onto the lane axis is a metadata-only reshape.
    x_flat = x.reshape(N, C1, H * W)

    out_flat = pl.pallas_call(
        functools.partial(_sepconv_kernel, k=k, d=d, pad=pad, H=H, W=W, Wp=Wp),
        out_shape=jax.ShapeDtypeStruct((N, C2, L), jnp.float32),
        grid=(N,),                            # whole image per step; N even -> both v7x TCs busy
        in_specs=[
            pl.BlockSpec((1, C1, H * W), lambda n: (n, 0, 0)),
            # Weights / bias stay VMEM-resident (constant block index across the grid).
            pl.BlockSpec((k * k, C1, 1), lambda n: (0, 0, 0)),
            pl.BlockSpec((C2, C1), lambda n: (0, 0)),
            pl.BlockSpec((C2, 1), lambda n: (0, 0)),
        ],
        out_specs=pl.BlockSpec((1, C2, L), lambda n: (n, 0, 0)),
        scratch_shapes=[pltpu.VMEM((C1, flat_len), jnp.float32)],
        compiler_params=pltpu.CompilerParams(
            dimension_semantics=("parallel",),
            # Working set is ~50 KiB/step: well under the default scoped VMEM on v5e/v6e/v7x,
            # so no vmem_limit_bytes override is needed at these shapes.
        ),
    )(x_flat, taps, wt, b)

    # Drop the (k_eff - 1) junk columns per row produced by the row-stride-Wp flattening.
    return out_flat.reshape(N, C2, Ho, Wp)[:, :, :, :Wo]


def reference(x, params, *, k=3, s=1, p=None, d=1, eps=1e-5):
    """Pure-JAX/XLA reference matching the PyTorch forward (BN in eval mode)."""
    pad = autopad(k, p, d)
    c1 = x.shape[1]
    dn = lax.conv_dimension_numbers(x.shape, params["dw_w"].shape, ("NCHW", "OIHW", "NCHW"))
    y = lax.conv_general_dilated(x, params["dw_w"], (s, s), [(pad, pad), (pad, pad)],
                                 rhs_dilation=(d, d), dimension_numbers=dn,
                                 feature_group_count=c1, precision=lax.Precision.HIGHEST)
    y = y + params["dw_b"].reshape(1, -1, 1, 1)
    dn2 = lax.conv_dimension_numbers(y.shape, params["pw_w"].shape, ("NCHW", "OIHW", "NCHW"))
    y = lax.conv_general_dilated(y, params["pw_w"], (s, s), [(0, 0), (0, 0)],
                                 dimension_numbers=dn2, precision=lax.Precision.HIGHEST)
    y = y + params["pw_b"].reshape(1, -1, 1, 1)
    scale = params["bn_gamma"] / jnp.sqrt(params["bn_var"] + eps)
    shift = params["bn_beta"] - params["bn_mean"] * scale
    y = y * scale.reshape(1, -1, 1, 1) + shift.reshape(1, -1, 1, 1)
    return y * jax.nn.sigmoid(y)


if __name__ == "__main__":
    # SeparableConv(c1=4, c2=8, k=3, s=1, p=None, d=1, act=True, has_bias=True)
    c1, c2, k, s, d = 4, 8, 3, 1, 1
    N, H, W = 2, 16, 16

    key = jax.random.PRNGKey(0)
    keys = jax.random.split(key, 9)
    x = jax.random.normal(keys[0], (N, c1, H, W), jnp.float32)

    params = {
        "dw_w": jax.random.normal(keys[1], (c1, 1, k, k), jnp.float32) * 0.3,   # Conv2d(c1,c1,k,groups=c1)
        "dw_b": jax.random.normal(keys[2], (c1,), jnp.float32) * 0.1,
        "pw_w": jax.random.normal(keys[3], (c2, c1, 1, 1), jnp.float32) * 0.3,  # Conv2d(c1,c2,1)
        "pw_b": jax.random.normal(keys[4], (c2,), jnp.float32) * 0.1,
        "bn_gamma": jax.random.normal(keys[5], (c2,), jnp.float32) * 0.1 + 1.0,
        "bn_beta": jax.random.normal(keys[6], (c2,), jnp.float32) * 0.1,
        "bn_mean": jax.random.normal(keys[7], (c2,), jnp.float32) * 0.1,
        "bn_var": jax.nn.softplus(jax.random.normal(keys[8], (c2,), jnp.float32)) + 0.5,
    }

    fwd = jax.jit(functools.partial(separable_conv, k=k, s=s, d=d))
    out = jax.block_until_ready(fwd(x, params))

    ref = reference(x, params, k=k, s=s, d=d)
    assert out.shape == ref.shape, (out.shape, ref.shape)
    max_err = float(jnp.max(jnp.abs(out - ref)))
    assert jnp.allclose(out, ref, rtol=1e-4, atol=1e-4), f"max abs err = {max_err}"

    print("KERNEL_OK")
</pallas_src>

<mosaic_0001>
module attributes {stable_mosaic.version = 11 : i64} {
  func.func @_sepconv_kernel(%arg0: i32, %arg1: memref<1x4x256xf32, #tpu.memory_space<vmem>>, %arg2: memref<9x4x1xf32, #tpu.memory_space<vmem>>, %arg3: memref<8x4xf32, #tpu.memory_space<vmem>>, %arg4: memref<8x1xf32, #tpu.memory_space<vmem>>, %arg5: memref<1x8x288xf32, #tpu.memory_space<vmem>>, %arg6: memref<4x326xf32, #tpu.memory_space<vmem>>) attributes {dimension_semantics = [#tpu.dimension_semantics<parallel>], iteration_bounds = array<i64: 2>, scalar_prefetch = 0 : i64, scratch_operands = 1 : i64, tpu.core_type = #tpu.core_type<tc>, window_params = [{transform_indices = @transform_0, window_bounds = array<i64: 1, 4, 256>}, {pipeline_mode = #tpu.pipeline_mode<synchronous>, transform_indices = @transform_1, window_bounds = array<i64: 9, 4, 1>}, {pipeline_mode = #tpu.pipeline_mode<synchronous>, transform_indices = @transform_2, window_bounds = array<i64: 8, 4>}, {pipeline_mode = #tpu.pipeline_mode<synchronous>, transform_indices = @transform_3, window_bounds = array<i64: 8, 1>}, {transform_indices = @transform_4, window_bounds = array<i64: 1, 8, 288>}]} {
    %cst = arith.constant 0.000000e+00 : f32
    %0 = vector.broadcast %cst : f32 to vector<4x326xf32>
    %c0 = arith.constant 0 : index
    %c0_0 = arith.constant 0 : index
    %1 = vector.load %arg6[%c0, %c0_0] : memref<4x326xf32, #tpu.memory_space<vmem>>, vector<4x326xf32>
    tpu.vector_store %arg6[%c0, %c0_0], %0 {strides = array<i32>} : memref<4x326xf32, #tpu.memory_space<vmem>>, vector<4x326xf32>,
    %c0_1 = arith.constant 0 : index
    %c0_2 = arith.constant 0 : index
    %c0_3 = arith.constant 0 : index
    %2 = vector.load %arg1[%c0_1, %c0_2, %c0_3] : memref<1x4x256xf32, #tpu.memory_space<vmem>>, vector<1x4x16xf32>
    %3 = vector.shape_cast %2 : vector<1x4x16xf32> to vector<4x16xf32>
    %c0_4 = arith.constant 0 : index
    %c19 = arith.constant 19 : index
    %4 = vector.load %arg6[%c0_4, %c19] : memref<4x326xf32, #tpu.memory_space<vmem>>, vector<4x16xf32>
    tpu.vector_store %arg6[%c0_4, %c19], %3 {strides = array<i32>} : memref<4x326xf32, #tpu.memory_space<vmem>>, vector<4x16xf32>,
    %c0_5 = arith.constant 0 : index
    %c0_6 = arith.constant 0 : index
    %c16 = arith.constant 16 : index
    %5 = vector.load %arg1[%c0_5, %c0_6, %c16] : memref<1x4x256xf32, #tpu.memory_space<vmem>>, vector<1x4x16xf32>
    %6 = vector.shape_cast %5 : vector<1x4x16xf32> to vector<4x16xf32>
    %c0_7 = arith.constant 0 : index
    %c37 = arith.constant 37 : index
    %7 = vector.load %arg6[%c0_7, %c37] : memref<4x326xf32, #tpu.memory_space<vmem>>, vector<4x16xf32>
    tpu.vector_store %arg6[%c0_7, %c37], %6 {strides = array<i32>} : memref<4x326xf32, #tpu.memory_space<vmem>>, vector<4x16xf32>,
    %c0_8 = arith.constant 0 : index
    %c0_9 = arith.constant 0 : index
    %c32 = arith.constant 32 : index
    %8 = vector.load %arg1[%c0_8, %c0_9, %c32] : memref<1x4x256xf32, #tpu.memory_space<vmem>>, vector<1x4x16xf32>
    %9 = vector.shape_cast %8 : vector<1x4x16xf32> to vector<4x16xf32>
    %c0_10 = arith.constant 0 : index
    %c55 = arith.constant 55 : index
    %10 = vector.load %arg6[%c0_10, %c55] : memref<4x326xf32, #tpu.memory_space<vmem>>, vector<4x16xf32>
    tpu.vector_store %arg6[%c0_10, %c55], %9 {strides = array<i32>} : memref<4x326xf32, #tpu.memory_space<vmem>>, vector<4x16xf32>,
    %c0_11 = arith.constant 0 : index
    %c0_12 = arith.constant 0 : index
    %c48 = arith.constant 48 : index
    %11 = vector.load %arg1[%c0_11, %c0_12, %c48] : memref<1x4x256xf32, #tpu.memory_space<vmem>>, vector<1x4x16xf32>
    %12 = vector.shape_cast %11 : vector<1x4x16xf32> to vector<4x16xf32>
    %c0_13 = arith.constant 0 : index
    %c73 = arith.constant 73 : index
    %13 = vector.load %arg6[%c0_13, %c73] : memref<4x326xf32, #tpu.memory_space<vmem>>, vector<4x16xf32>
    tpu.vector_store %arg6[%c0_13, %c73], %12 {strides = array<i32>} : memref<4x326xf32, #tpu.memory_space<vmem>>, vector<4x16xf32>,
    %c0_14 = arith.constant 0 : index
    %c0_15 = arith.constant 0 : index
    %c64 = arith.constant 64 : index
    %14 = vector.load %arg1[%c0_14, %c0_15, %c64] : memref<1x4x256xf32, #tpu.memory_space<vmem>>, vector<1x4x16xf32>
    %15 = vector.shape_cast %14 : vector<1x4x16xf32> to vector<4x16xf32>
    %c0_16 = arith.constant 0 : index
    %c91 = arith.constant 91 : index
    %16 = vector.load %arg6[%c0_16, %c91] : memref<4x326xf32, #tpu.memory_space<vmem>>, vector<4x16xf32>
    tpu.vector_store %arg6[%c0_16, %c91], %15 {strides = array<i32>} : memref<4x326xf32, #tpu.memory_space<vmem>>, vector<4x16xf32>,
    %c0_17 = arith.constant 0 : index
    %c0_18 = arith.constant 0 : index
    %c80 = arith.constant 80 : index
    %17 = vector.load %arg1[%c0_17, %c0_18, %c80] : memref<1x4x256xf32, #tpu.memory_space<vmem>>, vector<1x4x16xf32>
    %18 = vector.shape_cast %17 : vector<1x4x16xf32> to vector<4x16xf32>
    %c0_19 = arith.constant 0 : index
    %c109 = arith.constant 109 : index
    %19 = vector.load %arg6[%c0_19, %c109] : memref<4x326xf32, #tpu.memory_space<vmem>>, vector<4x16xf32>
    tpu.vector_store %arg6[%c0_19, %c109], %18 {strides = array<i32>} : memref<4x326xf32, #tpu.memory_space<vmem>>, vector<4x16xf32>,
    %c0_20 = arith.constant 0 : index
    %c0_21 = arith.constant 0 : index
    %c96 = arith.constant 96 : index
    %20 = vector.load %arg1[%c0_20, %c0_21, %c96] : memref<1x4x256xf32, #tpu.memory_space<vmem>>, vector<1x4x16xf32>
    %21 = vector.shape_cast %20 : vector<1x4x16xf32> to vector<4x16xf32>
    %c0_22 = arith.constant 0 : index
    %c127 = arith.constant 127 : index
    %22 = vector.load %arg6[%c0_22, %c127] : memref<4x326xf32, #tpu.memory_space<vmem>>, vector<4x16xf32>
    tpu.vector_store %arg6[%c0_22, %c127], %21 {strides = array<i32>} : memref<4x326xf32, #tpu.memory_space<vmem>>, vector<4x16xf32>,
    %c0_23 = arith.constant 0 : index
    %c0_24 = arith.constant 0 : index
    %c112 = arith.constant 112 : index
    %23 = vector.load %arg1[%c0_23, %c0_24, %c112] : memref<1x4x256xf32, #tpu.memory_space<vmem>>, vector<1x4x16xf32>
    %24 = vector.shape_cast %23 : vector<1x4x16xf32> to vector<4x16xf32>
    %c0_25 = arith.constant 0 : index
    %c145 = arith.constant 145 : index
    %25 = vector.load %arg6[%c0_25, %c145] : memref<4x326xf32, #tpu.memory_space<vmem>>, vector<4x16xf32>
    tpu.vector_store %arg6[%c0_25, %c145], %24 {strides = array<i32>} : memref<4x326xf32, #tpu.memory_space<vmem>>, vector<4x16xf32>,
    %c0_26 = arith.constant 0 : index
    %c0_27 = arith.constant 0 : index
    %c128 = arith.constant 128 : index
    %26 = vector.load %arg1[%c0_26, %c0_27, %c128] : memref<1x4x256xf32, #tpu.memory_space<vmem>>, vector<1x4x16xf32>
    %27 = vector.shape_cast %26 : vector<1x4x16xf32> to vector<4x16xf32>
    %c0_28 = arith.constant 0 : index
    %c163 = arith.constant 163 : index
    %28 = vector.load %arg6[%c0_28, %c163] : memref<4x326xf32, #tpu.memory_space<vmem>>, vector<4x16xf32>
    tpu.vector_store %arg6[%c0_28, %c163], %27 {strides = array<i32>} : memref<4x326xf32, #tpu.memory_space<vmem>>, vector<4x16xf32>,
    %c0_29 = arith.constant 0 : index
    %c0_30 = arith.constant 0 : index
    %c144 = arith.constant 144 : index
    %29 = vector.load %arg1[%c0_29, %c0_30, %c144] : memref<1x4x256xf32, #tpu.memory_space<vmem>>, vector<1x4x16xf32>
    %30 = vector.shape_cast %29 : vector<1x4x16xf32> to vector<4x16xf32>
    %c0_31 = arith.constant 0 : index
    %c181 = arith.constant 181 : index
    %31 = vector.load %arg6[%c0_31, %c181] : memref<4x326xf32, #tpu.memory_space<vmem>>, vector<4x16xf32>
    tpu.vector_store %arg6[%c0_31, %c181], %30 {strides = array<i32>} : memref<4x326xf32, #tpu.memory_space<vmem>>, vector<4x16xf32>,
    %c0_32 = arith.constant 0 : index
    %c0_33 = arith.constant 0 : index
    %c160 = arith.constant 160 : index
    %32 = vector.load %arg1[%c0_32, %c0_33, %c160] : memref<1x4x256xf32, #tpu.memory_space<vmem>>, vector<1x4x16xf32>
    %33 = vector.shape_cast %32 : vector<1x4x16xf32> to vector<4x16xf32>
    %c0_34 = arith.constant 0 : index
    %c199 = arith.constant 199 : index
    %34 = vector.load %arg6[%c0_34, %c199] : memref<4x326xf32, #tpu.memory_space<vmem>>, vector<4x16xf32>
    tpu.vector_store %arg6[%c0_34, %c199], %33 {strides = array<i32>} : memref<4x326xf32, #tpu.memory_space<vmem>>, vector<4x16xf32>,
    %c0_35 = arith.constant 0 : index
    %c0_36 = arith.constant 0 : index
    %c176 = arith.constant 176 : index
    %35 = vector.load %arg1[%c0_35, %c0_36, %c176] : memref<1x4x256xf32, #tpu.memory_space<vmem>>, vector<1x4x16xf32>
    %36 = vector.shape_cast %35 : vector<1x4x16xf32> to vector<4x16xf32>
    %c0_37 = arith.constant 0 : index
    %c217 = arith.constant 217 : index
    %37 = vector.load %arg6[%c0_37, %c217] : memref<4x326xf32, #tpu.memory_space<vmem>>, vector<4x16xf32>
    tpu.vector_store %arg6[%c0_37, %c217], %36 {strides = array<i32>} : memref<4x326xf32, #tpu.memory_space<vmem>>, vector<4x16xf32>,
    %c0_38 = arith.constant 0 : index
    %c0_39 = arith.constant 0 : index
    %c192 = arith.constant 192 : index
    %38 = vector.load %arg1[%c0_38, %c0_39, %c192] : memref<1x4x256xf32, #tpu.memory_space<vmem>>, vector<1x4x16xf32>
    %39 = vector.shape_cast %38 : vector<1x4x16xf32> to vector<4x16xf32>
    %c0_40 = arith.constant 0 : index
    %c235 = arith.constant 235 : index
    %40 = vector.load %arg6[%c0_40, %c235] : memref<4x326xf32, #tpu.memory_space<vmem>>, vector<4x16xf32>
    tpu.vector_store %arg6[%c0_40, %c235], %39 {strides = array<i32>} : memref<4x326xf32, #tpu.memory_space<vmem>>, vector<4x16xf32>,
    %c0_41 = arith.constant 0 : index
    %c0_42 = arith.constant 0 : index
    %c208 = arith.constant 208 : index
    %41 = vector.load %arg1[%c0_41, %c0_42, %c208] : memref<1x4x256xf32, #tpu.memory_space<vmem>>, vector<1x4x16xf32>
    %42 = vector.shape_cast %41 : vector<1x4x16xf32> to vector<4x16xf32>
    %c0_43 = arith.constant 0 : index
    %c253 = arith.constant 253 : index
    %43 = vector.load %arg6[%c0_43, %c253] : memref<4x326xf32, #tpu.memory_space<vmem>>, vector<4x16xf32>
    tpu.vector_store %arg6[%c0_43, %c253], %42 {strides = array<i32>} : memref<4x326xf32, #tpu.memory_space<vmem>>, vector<4x16xf32>,
    %c0_44 = arith.constant 0 : index
    %c0_45 = arith.constant 0 : index
    %c224 = arith.constant 224 : index
    %44 = vector.load %arg1[%c0_44, %c0_45, %c224] : memref<1x4x256xf32, #tpu.memory_space<vmem>>, vector<1x4x16xf32>
    %45 = vector.shape_cast %44 : vector<1x4x16xf32> to vector<4x16xf32>
    %c0_46 = arith.constant 0 : index
    %c271 = arith.constant 271 : index
    %46 = vector.load %arg6[%c0_46, %c271] : memref<4x326xf32, #tpu.memory_space<vmem>>, vector<4x16xf32>
    tpu.vector_store %arg6[%c0_46, %c271], %45 {strides = array<i32>} : memref<4x326xf32, #tpu.memory_space<vmem>>, vector<4x16xf32>,
    %c0_47 = arith.constant 0 : index
    %c0_48 = arith.constant 0 : index
    %c240 = arith.constant 240 : index
    %47 = vector.load %arg1[%c0_47, %c0_48, %c240] : memref<1x4x256xf32, #tpu.memory_space<vmem>>, vector<1x4x16xf32>
    %48 = vector.shape_cast %47 : vector<1x4x16xf32> to vector<4x16xf32>
    %c0_49 = arith.constant 0 : index
    %c289 = arith.constant 289 : index
    %49 = vector.load %arg6[%c0_49, %c289] : memref<4x326xf32, #tpu.memory_space<vmem>>, vector<4x16xf32>
    tpu.vector_store %arg6[%c0_49, %c289], %48 {strides = array<i32>} : memref<4x326xf32, #tpu.memory_space<vmem>>, vector<4x16xf32>,
    %c0_50 = arith.constant 0 : index
    %c0_51 = arith.constant 0 : index
    %c0_52 = arith.constant 0 : index
    %50 = vector.load %arg2[%c0_50, %c0_51, %c0_52] : memref<9x4x1xf32, #tpu.memory_space<vmem>>, vector<9x4x1xf32>
    %cst_53 = arith.constant 0.000000e+00 : f32
    %51 = vector.broadcast %cst_53 : f32 to vector<4x288xf32>
    %c0_54 = arith.constant 0 : index
    %c0_55 = arith.constant 0 : index
    %52 = vector.load %arg6[%c0_54, %c0_55] : memref<4x326xf32, #tpu.memory_space<vmem>>, vector<4x288xf32>
    %53 = vector.extract_strided_slice %50 {offsets = [0, 0, 0], sizes = [1, 4, 1], strides = [1, 1, 1]} : vector<9x4x1xf32> to vector<1x4x1xf32>
    %54 = vector.shape_cast %53 : vector<1x4x1xf32> to vector<4x1xf32>
    %55 = vector.broadcast %54 : vector<4x1xf32> to vector<4x288xf32>
    %56 = arith.mulf %52, %55 : vector<4x288xf32>
    %57 = arith.addf %51, %56 : vector<4x288xf32>
    %c0_56 = arith.constant 0 : index
    %c1 = arith.constant 1 : index
    %58 = vector.load %arg6[%c0_56, %c1] : memref<4x326xf32, #tpu.memory_space<vmem>>, vector<4x288xf32>
    %59 = vector.extract_strided_slice %50 {offsets = [1, 0, 0], sizes = [1, 4, 1], strides = [1, 1, 1]} : vector<9x4x1xf32> to vector<1x4x1xf32>
    %60 = vector.shape_cast %59 : vector<1x4x1xf32> to vector<4x1xf32>
    %61 = vector.broadcast %60 : vector<4x1xf32> to vector<4x288xf32>
    %62 = arith.mulf %58, %61 : vector<4x288xf32>
    %63 = arith.addf %57, %62 : vector<4x288xf32>
    %c0_57 = arith.constant 0 : index
    %c2 = arith.constant 2 : index
    %64 = vector.load %arg6[%c0_57, %c2] : memref<4x326xf32, #tpu.memory_space<vmem>>, vector<4x288xf32>
    %65 = vector.extract_strided_slice %50 {offsets = [2, 0, 0], sizes = [1, 4, 1], strides = [1, 1, 1]} : vector<9x4x1xf32> to vector<1x4x1xf32>
    %66 = vector.shape_cast %65 : vector<1x4x1xf32> to vector<4x1xf32>
    %67 = vector.broadcast %66 : vector<4x1xf32> to vector<4x288xf32>
    %68 = arith.mulf %64, %67 : vector<4x288xf32>
    %69 = arith.addf %63, %68 : vector<4x288xf32>
    %c0_58 = arith.constant 0 : index
    %c18 = arith.constant 18 : index
    %70 = vector.load %arg6[%c0_58, %c18] : memref<4x326xf32, #tpu.memory_space<vmem>>, vector<4x288xf32>
    %71 = vector.extract_strided_slice %50 {offsets = [3, 0, 0], sizes = [1, 4, 1], strides = [1, 1, 1]} : vector<9x4x1xf32> to vector<1x4x1xf32>
    %72 = vector.shape_cast %71 : vector<1x4x1xf32> to vector<4x1xf32>
    %73 = vector.broadcast %72 : vector<4x1xf32> to vector<4x288xf32>
    %74 = arith.mulf %70, %73 : vector<4x288xf32>
    %75 = arith.addf %69, %74 : vector<4x288xf32>
    %c0_59 = arith.constant 0 : index
    %c19_60 = arith.constant 19 : index
    %76 = vector.load %arg6[%c0_59, %c19_60] : memref<4x326xf32, #tpu.memory_space<vmem>>, vector<4x288xf32>
    %77 = vector.extract_strided_slice %50 {offsets = [4, 0, 0], sizes = [1, 4, 1], strides = [1, 1, 1]} : vector<9x4x1xf32> to vector<1x4x1xf32>
    %78 = vector.shape_cast %77 : vector<1x4x1xf32> to vector<4x1xf32>
    %79 = vector.broadcast %78 : vector<4x1xf32> to vector<4x288xf32>
    %80 = arith.mulf %76, %79 : vector<4x288xf32>
    %81 = arith.addf %75, %80 : vector<4x288xf32>
    %c0_61 = arith.constant 0 : index
    %c20 = arith.constant 20 : index
    %82 = vector.load %arg6[%c0_61, %c20] : memref<4x326xf32, #tpu.memory_space<vmem>>, vector<4x288xf32>
    %83 = vector.extract_strided_slice %50 {offsets = [5, 0, 0], sizes = [1, 4, 1], strides = [1, 1, 1]} : vector<9x4x1xf32> to vector<1x4x1xf32>
    %84 = vector.shape_cast %83 : vector<1x4x1xf32> to vector<4x1xf32>
    %85 = vector.broadcast %84 : vector<4x1xf32> to vector<4x288xf32>
    %86 = arith.mulf %82, %85 : vector<4x288xf32>
    %87 = arith.addf %81, %86 : vector<4x288xf32>
    %c0_62 = arith.constant 0 : index
    %c36 = arith.constant 36 : index
    %88 = vector.load %arg6[%c0_62, %c36] : memref<4x326xf32, #tpu.memory_space<vmem>>, vector<4x288xf32>
    %89 = vector.extract_strided_slice %50 {offsets = [6, 0, 0], sizes = [1, 4, 1], strides = [1, 1, 1]} : vector<9x4x1xf32> to vector<1x4x1xf32>
    %90 = vector.shape_cast %89 : vector<1x4x1xf32> to vector<4x1xf32>
    %91 = vector.broadcast %90 : vector<4x1xf32> to vector<4x288xf32>
    %92 = arith.mulf %88, %91 : vector<4x288xf32>
    %93 = arith.addf %87, %92 : vector<4x288xf32>
    %c0_63 = arith.constant 0 : index
    %c37_64 = arith.constant 37 : index
    %94 = vector.load %arg6[%c0_63, %c37_64] : memref<4x326xf32, #tpu.memory_space<vmem>>, vector<4x288xf32>
    %95 = vector.extract_strided_slice %50 {offsets = [7, 0, 0], sizes = [1, 4, 1], strides = [1, 1, 1]} : vector<9x4x1xf32> to vector<1x4x1xf32>
    %96 = vector.shape_cast %95 : vector<1x4x1xf32> to vector<4x1xf32>
    %97 = vector.broadcast %96 : vector<4x1xf32> to vector<4x288xf32>
    %98 = arith.mulf %94, %97 : vector<4x288xf32>
    %99 = arith.addf %93, %98 : vector<4x288xf32>
    %c0_65 = arith.constant 0 : index
    %c38 = arith.constant 38 : index
    %100 = vector.load %arg6[%c0_65, %c38] : memref<4x326xf32, #tpu.memory_space<vmem>>, vector<4x288xf32>
    %101 = vector.extract_strided_slice %50 {offsets = [8, 0, 0], sizes = [1, 4, 1], strides = [1, 1, 1]} : vector<9x4x1xf32> to vector<1x4x1xf32>
    %102 = vector.shape_cast %101 : vector<1x4x1xf32> to vector<4x1xf32>
    %103 = vector.broadcast %102 : vector<4x1xf32> to vector<4x288xf32>
    %104 = arith.mulf %100, %103 : vector<4x288xf32>
    %105 = arith.addf %99, %104 : vector<4x288xf32>
    %c0_66 = arith.constant 0 : index
    %c0_67 = arith.constant 0 : index
    %106 = vector.load %arg3[%c0_66, %c0_67] : memref<8x4xf32, #tpu.memory_space<vmem>>, vector<8x4xf32>
    %cst_68 = arith.constant 0.000000e+00 : f32
    %107 = vector.broadcast %cst_68 : f32 to vector<8x288xf32>
    %108 = vector.extract_strided_slice %106 {offsets = [0, 0], sizes = [8, 1], strides = [1, 1]} : vector<8x4xf32> to vector<8x1xf32>
    %109 = vector.extract_strided_slice %105 {offsets = [0, 0], sizes = [1, 288], strides = [1, 1]} : vector<4x288xf32> to vector<1x288xf32>
    %110 = vector.broadcast %108 : vector<8x1xf32> to vector<8x288xf32>
    %111 = vector.broadcast %109 : vector<1x288xf32> to vector<8x288xf32>
    %112 = arith.mulf %110, %111 : vector<8x288xf32>
    %113 = arith.addf %107, %112 : vector<8x288xf32>
    %114 = vector.extract_strided_slice %106 {offsets = [0, 1], sizes = [8, 1], strides = [1, 1]} : vector<8x4xf32> to vector<8x1xf32>
    %115 = vector.extract_strided_slice %105 {offsets = [1, 0], sizes = [1, 288], strides = [1, 1]} : vector<4x288xf32> to vector<1x288xf32>
    %116 = vector.broadcast %114 : vector<8x1xf32> to vector<8x288xf32>
    %117 = vector.broadcast %115 : vector<1x288xf32> to vector<8x288xf32>
    %118 = arith.mulf %116, %117 : vector<8x288xf32>
    %119 = arith.addf %113, %118 : vector<8x288xf32>
    %120 = vector.extract_strided_slice %106 {offsets = [0, 2], sizes = [8, 1], strides = [1, 1]} : vector<8x4xf32> to vector<8x1xf32>
    %121 = vector.extract_strided_slice %105 {offsets = [2, 0], sizes = [1, 288], strides = [1, 1]} : vector<4x288xf32> to vector<1x288xf32>
    %122 = vector.broadcast %120 : vector<8x1xf32> to vector<8x288xf32>
    %123 = vector.broadcast %121 : vector<1x288xf32> to vector<8x288xf32>
    %124 = arith.mulf %122, %123 : vector<8x288xf32>
    %125 = arith.addf %119, %124 : vector<8x288xf32>
    %126 = vector.extract_strided_slice %106 {offsets = [0, 3], sizes = [8, 1], strides = [1, 1]} : vector<8x4xf32> to vector<8x1xf32>
    %127 = vector.extract_strided_slice %105 {offsets = [3, 0], sizes = [1, 288], strides = [1, 1]} : vector<4x288xf32> to vector<1x288xf32>
    %128 = vector.broadcast %126 : vector<8x1xf32> to vector<8x288xf32>
    %129 = vector.broadcast %127 : vector<1x288xf32> to vector<8x288xf32>
    %130 = arith.mulf %128, %129 : vector<8x288xf32>
    %131 = arith.addf %125, %130 : vector<8x288xf32>
    %c0_69 = arith.constant 0 : index
    %c0_70 = arith.constant 0 : index
    %132 = vector.load %arg4[%c0_69, %c0_70] : memref<8x1xf32, #tpu.memory_space<vmem>>, vector<8x1xf32>
    %133 = vector.broadcast %132 : vector<8x1xf32> to vector<8x288xf32>
    %134 = arith.addf %131, %133 : vector<8x288xf32>
    %135 = arith.negf %134 : vector<8x288xf32>
    %136 = math.exp %135 : vector<8x288xf32>
    %cst_71 = arith.constant 1.000000e+00 : f32
    %137 = vector.broadcast %cst_71 : f32 to vector<8x288xf32>
    %138 = arith.addf %137, %136 : vector<8x288xf32>
    %139 = arith.divf %137, %138 : vector<8x288xf32>
    %140 = arith.mulf %134, %139 : vector<8x288xf32>
    %c0_72 = arith.constant 0 : index
    %c0_73 = arith.constant 0 : index
    %c0_74 = arith.constant 0 : index
    %141 = vector.load %arg5[%c0_72, %c0_73, %c0_74] : memref<1x8x288xf32, #tpu.memory_space<vmem>>, vector<1x8x288xf32>
    %142 = vector.shape_cast %141 : vector<1x8x288xf32> to vector<8x288xf32>
    %143 = vector.shape_cast %140 : vector<8x288xf32> to vector<1x8x288xf32>
    tpu.vector_store %arg5[%c0_72, %c0_73, %c0_74], %143 {strides = array<i32>} : memref<1x8x288xf32, #tpu.memory_space<vmem>>, vector<1x8x288xf32>,
    return
  }
  func.func @transform_0(%arg0: i32) -> (i32, i32, i32) {
    %c0_i32 = arith.constant 0 : i32
    %c0_i32_0 = arith.constant 0 : i32
    %c0_i32_1 = arith.constant 0 : i32
    return %arg0, %c0_i32, %c0_i32_0 : i32, i32, i32
  }
  func.func @transform_1(%arg0: i32) -> (i32, i32, i32) {
    %c0_i32 = arith.constant 0 : i32
    %c0_i32_0 = arith.constant 0 : i32
    %c0_i32_1 = arith.constant 0 : i32
    %c0_i32_2 = arith.constant 0 : i32
    return %c0_i32, %c0_i32_0, %c0_i32_1 : i32, i32, i32
  }
  func.func @transform_2(%arg0: i32) -> (i32, i32) {
    %c0_i32 = arith.constant 0 : i32
    %c0_i32_0 = arith.constant 0 : i32
    %c0_i32_1 = arith.constant 0 : i32
    return %c0_i32, %c0_i32_0 : i32, i32
  }
  func.func @transform_3(%arg0: i32) -> (i32, i32) {
    %c0_i32 = arith.constant 0 : i32
    %c0_i32_0 = arith.constant 0 : i32
    %c0_i32_1 = arith.constant 0 : i32
    return %c0_i32, %c0_i32_0 : i32, i32
  }
  func.func @transform_4(%arg0: i32) -> (i32, i32, i32) {
    %c0_i32 = arith.constant 0 : i32
    %c0_i32_0 = arith.constant 0 : i32
    %c0_i32_1 = arith.constant 0 : i32
    return %arg0, %c0_i32, %c0_i32_0 : i32, i32, i32
  }
}

</mosaic_0001>

<bundles_post_ra>
// kernel: separable_conv.1
= control target key start
LH: loop header
LB: loop body
LE: loop exit
PB: predicated region body
PF: predicated region fallthrough
CT: control target
= control target key end

     0   :  { %s959_s15 = smov 0   ;;  %s1057_s0 = inlined_call_operand.vmem [shape: f32[2,4,256], index: 0, kind: input, shape index: {}]   ;;  %s1058_s1 = inlined_call_operand.vmem [shape: f32[9,4,1], index: 1, kind: input, shape index: {}]   ;;  %s1059_s2 = inlined_call_operand.vmem [shape: f32[8,4], index: 2, kind: input, shape index: {}]   ;;  %s1060_s3 = inlined_call_operand.vmem [shape: f32[8,1], index: 3, kind: input, shape index: {}]   ;;  %s1061_s4 = inlined_call_operand.vmem [shape: f32[2,8,288], index: 4, kind: output, shape index: {}]  }
   0x1 LB: > { %s824_s16 = sadd.s32 4294967295, %s902_s15   ;;  %p828_p0 = scmp.ge.s32.totalorder %s902_s15, 1  ;;  %s902_s15 = sphi %s959_s15, %s14_s15  }
   0x2   : > { %p162_p1 = scmp.lt.s32.totalorder %s902_s15, 3 }
   0x4   : > { %p163_p2 = pnand %p828_p0, %p162_p1 }
   0x5   : > { %p188_p3 = scmp.lt.s32.totalorder (!%p163_p2), %s824_s16, 1  ;;  %v904_v0 = vmov (!%p163_p2), 0   ;;  %v905_v1 = vmov (!%p163_p2), 0.0   ;;  %vm199_vm0 = vcmask (!%p163_p2), 568320   ;;  %s906_s21 = smov (!%p163_p2), 23   ;;  %v922_v27 = vmov (!%p163_p2), 1  }
   0x6   : > { %166 = sbr.rel (%p163_p2) target bundleno = 382 (0x17e), region = 36  ;;  %877 = vset.pattern.permute.xlu1 (!%p163_p2), %v904_v0  ;;  %878 = vset.pattern.permute.xlu0 (!%p163_p2), %v904_v0  ;;  %198 = vst [vmem:[#allocation2] sm:$0xff] (!%p163_p2), %v905_v1  ;;  %200 = vst.msk [vmem:[#allocation2 + $0x8] sm:$0xf] (!%p163_p2), %vm199_vm0, %v905_v1  ;;  %s907_s22 = smov (!%p163_p2), 19   ;;  %vm206_vm1 = vcmask (!%p163_p2), 281752   ;;  %v341_v49 = vlaneseq (!%p163_p2) }
   0x7   : > { %s908_s23 = smov (!%p163_p2), 25   ;;  %s909_s24 = smov (!%p163_p2), 21   ;;  %v324_v16 = vld [vmem:[%s1058_s1 + $0x4] sm:$0xf] (!%p163_p2)  ;;  %v325_v18 = vld [vmem:[%s1058_s1 + $0x8] sm:$0xf] (!%p163_p2) }
   0x8   : > { %s910_s25 = smov (!%p163_p2), 27   ;;  %s911_s26 = smov (!%p163_p2), 31   ;;  %v327_v20 = vld [vmem:[%s1058_s1 + $0x10] sm:$0xf] (!%p163_p2)  ;;  %v326_v21 = vld [vmem:[%s1058_s1 + $0xc] sm:$0xf] (!%p163_p2) }
   0x9   : > { %s912_s27 = smov (!%p163_p2), 33   ;;  %s913_s28 = smov (!%p163_p2), 29   ;;  %v328_v22 = vld [vmem:[%s1058_s1 + $0x14] sm:$0xf] (!%p163_p2)  ;;  %v329_v23 = vld [vmem:[%s1058_s1 + $0x18] sm:$0xf] (!%p163_p2) }
   0xa   : > { %s914_s29 = smov (!%p163_p2), 37   ;;  %s915_s30 = smov (!%p163_p2), 35   ;;  %v330_v24 = vld [vmem:[%s1058_s1 + $0x1c] sm:$0xf] (!%p163_p2)  ;;  %v331_v25 = vld [vmem:[%s1058_s1 + $0x20] sm:$0xf] (!%p163_p2) }
   0xb   : > { %s916_s5 = smov (!%p163_p2), 45   ;;  %s917_s6 = smov (!%p163_p2), 39   ;;  %v323_v26 = vld [vmem:[%s1058_s1] sm:$0xf] (!%p163_p2)  ;;  %vm213_vm2 = vcmask (!%p163_p2), 429352   ;;  %vm220_vm3 = vcmask (!%p163_p2), 576952  }
   0xc   : > { %s918_s7 = smov (!%p163_p2), 43   ;;  %s919_s8 = smov (!%p163_p2), 41   ;;  %vm227_vm4 = vcmask (!%p163_p2), 724552   ;;  %vm234_vm5 = vcmask (!%p163_p2), 872152   ;;  %vm251_vm6 = vcmask (!%p163_p2), 1044472   ;;  %vm252_vm7 = vcmask (!%p163_p2), 121860  }
   0xd   : > { %s1063_s16 = smov (!%p188_p3, %s824_s16), 1  ;;  %s920_s11 = smov 47   ;;  %vm248_vm8 = vcmask 252928   ;;  %vm241_vm9 = vcmask 1019752   ;;  %vm253_vm10 = vmor %vm252_vm7, %vm251_vm6  ;;  %vm260_vm11 = vcmask 265352   ;;  %vm267_vm12 = vcmask 412952  }
   0xe   : > { %s837_s17 = sshll.u32 %s1063_s16, 3  ;;  %s921_s14 = smov 49   ;;  %vm274_vm13 = vcmask 560552   ;;  %vm281_vm14 = vcmask 708152   ;;  %vm305_vm15 = vcmask 1044456   ;;  %vm306_vm0 = vcmask 105476  }
   0xf   : > { %s975_s20 = scalar_lea.vmem %s1057_s0, %s837_s17  ;;  %vm321_vm6 = vcmask 396552   ;;  %v923_v47 = vmov 839922192   ;;  %v1020_v52 = vshrl.u32 %v341_v49, 7  ;;  %s928_s9 = smov 108   ;;  %vm372_vm7 = vcmask 1043456  }
  0x10   : > { %v215_v2 = vld [vmem:[%s975_s20] sm:$0xf]  ;;  %v269_v10 = vld [vmem:[%s975_s20 + $0x4] sm:$0xf]  ;;  %v339_v48 = vunpack.c.l.s4 %v923_v47  ;;  %s929_s10 = smov 92   ;;  %s931_s12 = smov 90  }
  0x11   : > { %v201_v3 = vld [vmem:[%s975_s20] sm:$0xf]  ;;  %217 = vrot.lane.b32.xlu1 %v215_v2, %s906_s21  ;;  %v262_v11 = vld [vmem:[%s975_s20 + $0x4] sm:$0xf]  ;;  %s838_s19 = smul.u32 24, %s1063_s16 }
  0x12   : > { %203 = vrot.lane.b32.xlu0 %v201_v3, %s907_s22  ;;  %v222_v4 = vld [vmem:[%s975_s20] sm:$0xf]  ;;  %v297_v12 = vld [vmem:[%s975_s20 + $0x4] sm:$0xf]  ;;  %v340_v51 = vunpack.c.0.s8 %v339_v48 }
  0x13   : > { %v208_v5 = vld [vmem:[%s975_s20] sm:$0xf]  ;;  %v276_v13 = vld [vmem:[%s975_s20 + $0x4] sm:$0xf] }
  0x14   : > { %v229_v6 = vld [vmem:[%s975_s20] sm:$0xf]  ;;  %v290_v14 = vld [vmem:[%s975_s20 + $0x4] sm:$0xf]  ;;  %v343_v53 = vsub.s32 %v340_v51, %v1020_v52 }
  0x15   : > { %224 = vrot.lane.b32.xlu1 %v222_v4, %s908_s23  ;;  %v243_v7 = vld [vmem:[%s975_s20] sm:$0xf]  ;;  %v283_v15 = vld [vmem:[%s975_s20 + $0x4] sm:$0xf]  ;;  %s197_s23 = scalar_lea.vmem %s1061_s4, %s838_s19 }
  0x16   : > { %210 = vrot.lane.b32.xlu0 %v208_v5, %s909_s24  ;;  %v255_v8 = vld [vmem:[%s975_s20] sm:$0xf]  ;;  %v309_v17 = vld [vmem:[%s975_s20 + $0x4] sm:$0xf] }
  0x17   : > { %v236_v9 = vld [vmem:[%s975_s20] sm:$0xf]  ;;  %v316_v19 = vld [vmem:[%s975_s20 + $0x4] sm:$0xf] }
  0x19   : > { %231 = vrot.lane.b32.xlu1 %v229_v6, %s910_s25 }
  0x1a   : > { %245 = vrot.lane.b32.xlu0 %v243_v7, %s911_s26 }
  0x1d   : > { %257 = vrot.lane.b32.xlu1 %v255_v8, %s912_s27 }
  0x1e   : > { %238 = vrot.lane.b32.xlu0 %v236_v9, %s913_s28 }
  0x21   : > { %271 = vrot.lane.b32.xlu1 %v269_v10, %s914_s29 }
  0x22   : > { %264 = vrot.lane.b32.xlu0 %v262_v11, %s915_s30 }
  0x25   : > { %299 = vrot.lane.b32.xlu1 %v297_v12, %s916_s5  ;;  %s924_s5 = smov 127  }
  0x26   : > { %278 = vrot.lane.b32.xlu0 %v276_v13, %s917_s6  ;;  %s925_s6 = smov 126  }
  0x29   : > { %292 = vrot.lane.b32.xlu1 %v290_v14, %s918_s7  ;;  %s926_s7 = smov 110  }
  0x2a   : > { %285 = vrot.lane.b32.xlu0 %v283_v15, %s919_s8  ;;  %s927_s8 = smov 109  }
  0x2d   : > { %352 = vperm.xlu1 %877, %v324_v16  }
  0x2e   : > { %311 = vrot.lane.b32.xlu0 %v309_v17, %s920_s11  ;;  %s930_s11 = smov 91  }
  0x31   : > { %382 = vperm.xlu1 %877, %v325_v18  }
  0x32   : > { %318 = vrot.lane.b32.xlu0 %v316_v19, %s921_s14 }
  0x35   : > { %440 = vperm.xlu1 %877, %v327_v20  }
  0x36   : > { %411 = vperm.xlu0 %878, %v326_v21  }
  0x39   : > { %469 = vperm.xlu1 %877, %v328_v22  }
  0x3a   : > { %498 = vperm.xlu0 %878, %v329_v23  }
  0x3d   : > { %527 = vperm.xlu1 %877, %v330_v24  }
  0x3e   : > { %556 = vperm.xlu0 %878, %v331_v25  }
  0x41   : > { %336 = vperm.xlu1 %877, %v323_v26  }
  0x45   : > { %879 = vset.pattern.permute.xlu1 %v922_v27 }
  0x83   : > { %v218_v28 = vpop.permute.xlu1 %217 }
  0x84   : > { %v204_v29 = vpop.permute.xlu0 %203 }
  0x85   : > { %207 = vst.msk [vmem:[#allocation2] sm:$0xf] %vm206_vm1, %v204_v29  ;;  %vm288_vm1 = vcmask 855752   ;;  %v583_v29 = vld [vmem:[%s1059_s2] sm:$0xff] }
  0x87   : > { %v225_v30 = vpop.permute.xlu1 %224 }
  0x88   : > { %v211_v31 = vpop.permute.xlu0 %210 }
  0x89   : > { %214 = vst.msk [vmem:[#allocation2] sm:$0xf] %vm213_vm2, %v211_v31  ;;  %vm302_vm2 = vcmask 367616   ;;  %v933_v31 = vmov 2  }
  0x8a   : > { %221 = vst.msk [vmem:[#allocation2] sm:$0xf] %vm220_vm3, %v218_v28  ;;  %vm295_vm3 = vcmask 1003352  }
  0x8b   : > { %228 = vst.msk [vmem:[#allocation2] sm:$0xf] %vm227_vm4, %v225_v30  ;;  %v232_v32 = vpop.permute.xlu1 %231  ;;  %vm307_vm4 = vmor %vm306_vm0, %vm305_vm15  ;;  %v932_v30 = vmov 3   ;;  %vm577_vm15 = vcmask 736256   ;;  %vm767_vm0 = vcmask 261120  }
  0x8c   : > { %v246_v33 = vpop.permute.xlu0 %245  ;;  %235 = vst.msk [vmem:[#allocation2] sm:$0xf] %vm234_vm5, %v232_v32  ;;  %vm314_vm5 = vcmask 248952   ;;  %v735_v32 = vld [vmem:[%s1060_s3] sm:$0xff] }
  0x8d   : > { %v247_v34 = vrot.slane %v246_v33, 4 }
  0x8f   : > { %v258_v35 = vpop.permute.xlu1 %257  ;;  %v249_v37 = vsel %vm248_vm8, %v247_v34, %v246_v33  ;;  %vm374_vm8 = vcmask 1039360  }
  0x90   : > { %v239_v36 = vpop.permute.xlu0 %238 }
  0x91   : > { %242 = vst.msk [vmem:[#allocation2] sm:$0xf] %vm241_vm9, %v239_v36  ;;  %vm403_vm9 = vcmask 1031168  }
  0x92   : > { %254 = vst.msk [vmem:[#allocation2] sm:$0xff] %vm253_vm10, %v249_v37  ;;  %vm432_vm10 = vcmask 900096  }
  0x93   : > { %261 = vst.msk [vmem:[#allocation2 + $0x4] sm:$0xf] %vm260_vm11, %v258_v35  ;;  %v272_v38 = vpop.permute.xlu1 %271  ;;  %vm461_vm11 = vcmask 891904  }
  0x94   : > { %v265_v39 = vpop.permute.xlu0 %264 }
  0x95   : > { %268 = vst.msk [vmem:[#allocation2 + $0x4] sm:$0xf] %vm267_vm12, %v265_v39  ;;  %vm490_vm12 = vcmask 883712  }
  0x96   : > { %275 = vst.msk [vmem:[#allocation2 + $0x4] sm:$0xf] %vm274_vm13, %v272_v38  ;;  %vm519_vm13 = vcmask 752640  }
  0x97   : > { %v300_v40 = vpop.permute.xlu1 %299 }
  0x98   : > { %v279_v41 = vpop.permute.xlu0 %278  ;;  %v301_v42 = vrot.slane %v300_v40, 4 }
  0x99   : > { %282 = vst.msk [vmem:[#allocation2 + $0x4] sm:$0xf] %vm281_vm14, %v279_v41  ;;  %vm548_vm14 = vcmask 744448  }
  0x9a   : > { %v303_v45 = vsel %vm302_vm2, %v301_v42, %v300_v40 }
  0x9b   : > { %v293_v43 = vpop.permute.xlu1 %292 }
  0x9c   : > { %v286_v44 = vpop.permute.xlu0 %285 }
  0x9d   : > { %289 = vst.msk [vmem:[#allocation2 + $0x4] sm:$0xf] %vm288_vm1, %v286_v44 }
  0x9e   : > { %296 = vst.msk [vmem:[#allocation2 + $0x4] sm:$0xf] %vm295_vm3, %v293_v43 }
  0x9f   : > { %308 = vst.msk [vmem:[#allocation2 + $0x4] sm:$0xff] %vm307_vm4, %v303_v45 }
  0xa0   : > { %v312_v46 = vpop.permute.xlu0 %311 }
  0xa1   : > { %315 = vst.msk [vmem:[#allocation2 + $0x8] sm:$0xf] %vm314_vm5, %v312_v46 }
  0xa4   : > { %v319_v50 = vpop.permute.xlu0 %318 }
  0xa5   : > { %322 = vst.msk [vmem:[#allocation2 + $0x8] sm:$0xf] %vm321_vm6, %v319_v50 }
  0xa6   : > { %v332_v56 = vld [vmem:[#allocation2] sm:$0xff] }
  0xac   : > { %v353_v54 = vpop.permute.xlu1 %352  ;;  %v333_v57 = vld [vmem:[#allocation2 + $0x8] sm:$0xf] }
  0xad   : > { %v360_v55 = vrot.slane %v353_v54, %v343_v53 }
  0xaf   : > { %v362_v58 = vmul.f32 %v360_v55, %v332_v56  ;;  %v363_v59 = vmul.f32 %v360_v55, %v333_v57 }
  0xb0   : > { %v383_v60 = vpop.permute.xlu1 %382 }
  0xb1   : > { %v390_v61 = vrot.slane %v383_v60, %v343_v53  ;;  %366 = vrot.lane.b32.xlu0 %v362_v58, %s924_s5  ;;  %368 = vrot.lane.b32.xlu1 %v363_v59, %s924_s5 }
  0xb3   : > { %v392_v62 = vmul.f32 %v390_v61, %v332_v56  ;;  %v393_v63 = vmul.f32 %v390_v61, %v333_v57 }
  0xb4   : > { %v441_v1 = vpop.permute.xlu1 %440 }
  0xb5   : > { %v412_v2 = vpop.permute.xlu0 %411  ;;  %396 = vrot.lane.b32.xlu0 %v392_v62, %s925_s6  ;;  %398 = vrot.lane.b32.xlu1 %v393_v63, %s925_s6  ;;  %v448_v4 = vrot.slane %v441_v1, %v343_v53 }
  0xb6   : > { %v419_v3 = vrot.slane %v412_v2, %v343_v53 }
  0xb7   : > { %v450_v8 = vmul.f32 %v448_v4, %v332_v56  ;;  %v451_v9 = vmul.f32 %v448_v4, %v333_v57 }
  0xb8   : > { %v421_v5 = vmul.f32 %v419_v3, %v332_v56  ;;  %v422_v6 = vmul.f32 %v419_v3, %v333_v57  ;;  %v470_v7 = vpop.permute.xlu1 %469 }
  0xb9   : > { %v477_v10 = vrot.slane %v470_v7, %v343_v53  ;;  %v499_v11 = vpop.permute.xlu0 %498 }
  0xba   : > { %427 = vrot.lane.b32.xlu1 %v422_v6, %s926_s7  ;;  %425 = vrot.lane.b32.xlu0 %v421_v5, %s926_s7  ;;  %v506_v13 = vrot.slane %v499_v11, %v343_v53 }
  0xbb   : > { %v479_v14 = vmul.f32 %v477_v10, %v332_v56  ;;  %v480_v15 = vmul.f32 %v477_v10, %v333_v57 }
  0xbc   : > { %v528_v12 = vpop.permute.xlu1 %527  ;;  %v508_v18 = vmul.f32 %v506_v13, %v332_v56  ;;  %v509_v19 = vmul.f32 %v506_v13, %v333_v57 }
  0xbd   : > { %v535_v20 = vrot.slane %v528_v12, %v343_v53  ;;  %v557_v23 = vpop.permute.xlu0 %556 }
  0xbe   : > { %456 = vrot.lane.b32.xlu1 %v451_v9, %s927_s8  ;;  %454 = vrot.lane.b32.xlu0 %v450_v8, %s927_s8  ;;  %v564_v26 = vrot.slane %v557_v23, %v343_v53 }
  0xbf   : > { %v537_v24 = vmul.f32 %v535_v20, %v332_v56  ;;  %v538_v25 = vmul.f32 %v535_v20, %v333_v57 }
  0xc0   : > { %v337_v16 = vpop.permute.xlu1 %336  ;;  %v566_v27 = vmul.f32 %v564_v26, %v332_v56  ;;  %v567_v28 = vmul.f32 %v564_v26, %v333_v57 }
  0xc1   : > { %v344_v17 = vrot.slane %v337_v16, %v343_v53 }
  0xc2   : > { %485 = vrot.lane.b32.xlu1 %v480_v15, %s928_s9  ;;  %483 = vrot.lane.b32.xlu0 %v479_v14, %s928_s9 }
  0xc3   : > { %v1023_v21 = vmul.f32 %v344_v17, %v332_v56  ;;  %v347_v22 = vmul.f32 %v344_v17, %v333_v57 }
  0xc6   : > { %514 = vrot.lane.b32.xlu1 %v509_v19, %s929_s10  ;;  %512 = vrot.lane.b32.xlu0 %v508_v18, %s929_s10 }
  0xca   : > { %543 = vrot.lane.b32.xlu1 %v538_v25, %s930_s11  ;;  %541 = vrot.lane.b32.xlu0 %v537_v24, %s930_s11 }
  0xce   : > { %572 = vrot.lane.b32.xlu1 %v567_v28, %s931_s12  ;;  %570 = vrot.lane.b32.xlu0 %v566_v27, %s931_s12 }
  0xd2   : > { %625 = vperm.xlu1 %879, %v583_v29   ;;  %586 = vperm.xlu0 %878, %v583_v29  }
  0xd6   : > { %881 = vset.pattern.permute.xlu1 %v932_v30  ;;  %880 = vset.pattern.permute.xlu0 %v933_v31 }
  0xd7   : > { %699 = vperm.xlu1 %881, %v583_v29   ;;  %662 = vperm.xlu0 %880, %v583_v29  }
  0xdb   : > { %882 = vset.pattern.permute.xlu1 %v904_v0  ;;  %883 = vset.pattern.permute.xlu0 %v904_v0 }
  0xdc   : > { %738 = vperm.xlu1 %882, %v735_v32  }
 0x123   : > { %v369_v33 = vpop.permute.xlu1 %368  ;;  %v367_v34 = vpop.permute.xlu0 %366 }
 0x124   : > { %v371_v41 = vrot.slane %v369_v33, 4  ;;  %v370_v42 = vrot.slane %v367_v34, 4  ;;  %v379_v59 = vadd.f32 %v369_v33, %v347_v22 }
 0x126   : > { %v373_v47 = vsel %vm372_vm7, %v370_v42, %v371_v41 }
 0x127   : > { %v399_v35 = vpop.permute.xlu1 %398  ;;  %v397_v36 = vpop.permute.xlu0 %396  ;;  %v375_v53 = vsel %vm374_vm8, %v367_v34, %v373_v47  ;;  %v630_v34 = vsub.s32 1, %v1020_v52  ;;  %v708_v47 = vsub.s32 7, %v1020_v52 }
 0x128   : > { %v401_v43 = vrot.slane %v399_v35, 4  ;;  %v400_v44 = vrot.slane %v397_v36, 4  ;;  %v378_v61 = vadd.f32 %v375_v53, %v1023_v21  ;;  %v408_v2 = vadd.f32 %v399_v35, %v379_v59 }
 0x129   : > { %v634_v35 = vsub.s32 5, %v1020_v52 }
 0x12a   : > { %v402_v49 = vsel %vm372_vm7, %v400_v44, %v401_v43 }
 0x12b   : > { %v404_v60 = vsel %vm403_vm9, %v397_v36, %v402_v49  ;;  %v593_v36 = vsub.s32 0, %v1020_v52 }
 0x12c   : > { %v428_v37 = vpop.permute.xlu1 %427  ;;  %v426_v38 = vpop.permute.xlu0 %425  ;;  %v407_v6 = vadd.f32 %v404_v60, %v378_v61 }
 0x12d   : > { %v430_v0 = vrot.slane %v428_v37, 4  ;;  %v429_v48 = vrot.slane %v426_v38, 4  ;;  %v437_v10 = vadd.f32 %v428_v37, %v408_v2  ;;  %v597_v37 = vsub.s32 4, %v1020_v52 }
 0x12f   : > { %v431_v56 = vsel %vm372_vm7, %v429_v48, %v430_v0 }
 0x130   : > { %v457_v39 = vpop.permute.xlu1 %456  ;;  %v455_v40 = vpop.permute.xlu0 %454  ;;  %v433_v3 = vsel %vm432_vm10, %v426_v38, %v431_v56  ;;  %v704_v38 = vsub.s32 3, %v1020_v52 }
 0x131   : > { %v459_v50 = vrot.slane %v457_v39, 4  ;;  %v458_v51 = vrot.slane %v455_v40, 4  ;;  %v436_v12 = vadd.f32 %v433_v3, %v407_v6  ;;  %v466_v14 = vadd.f32 %v457_v39, %v437_v10 }
 0x132   : > { %v667_v39 = vsub.s32 2, %v1020_v52 }
 0x133   : > { %v460_v62 = vsel %vm372_vm7, %v458_v51, %v459_v50 }
 0x134   : > { %v486_v45 = vpop.permute.xlu1 %485  ;;  %v484_v46 = vpop.permute.xlu0 %483  ;;  %v462_v11 = vsel %vm461_vm11, %v455_v40, %v460_v62 }
 0x135   : > { %v488_v57 = vrot.slane %v486_v45, 4  ;;  %v487_v58 = vrot.slane %v484_v46, 4  ;;  %v465_v18 = vadd.f32 %v462_v11, %v436_v12  ;;  %v495_v23 = vadd.f32 %v486_v45, %v466_v14 }
 0x137   : > { %v489_v7 = vsel %vm372_vm7, %v487_v58, %v488_v57 }
 0x138   : > { %v515_v54 = vpop.permute.xlu1 %514  ;;  %v513_v55 = vpop.permute.xlu0 %512  ;;  %v491_v15 = vsel %vm490_vm12, %v484_v46, %v489_v7  ;;  %v671_v46 = vsub.s32 6, %v1020_v52 }
 0x139   : > { %v517_v63 = vrot.slane %v515_v54, 4  ;;  %v516_v1 = vrot.slane %v513_v55, 4  ;;  %v494_v24 = vadd.f32 %v491_v15, %v465_v18  ;;  %v524_v27 = vadd.f32 %v515_v54, %v495_v23 }
 0x13b   : > { %v518_v13 = vsel %vm372_vm7, %v516_v1, %v517_v63 }
 0x13c   : > { %v544_v4 = vpop.permute.xlu1 %543  ;;  %v542_v5 = vpop.permute.xlu0 %541  ;;  %v520_v22 = vsel %vm519_vm13, %v513_v55, %v518_v13 }
 0x13d   : > { %v546_v8 = vrot.slane %v544_v4, 4  ;;  %v545_v9 = vrot.slane %v542_v5, 4  ;;  %v523_v28 = vadd.f32 %v520_v22, %v494_v24  ;;  %v553_v30 = vadd.f32 %v544_v4, %v524_v27 }
 0x13f   : > { %v547_v19 = vsel %vm372_vm7, %v545_v9, %v546_v8 }
 0x140   : > { %v573_v16 = vpop.permute.xlu1 %572  ;;  %v571_v17 = vpop.permute.xlu0 %570  ;;  %v549_v26 = vsel %vm548_vm14, %v542_v5, %v547_v19 }
 0x141   : > { %v575_v20 = vrot.slane %v573_v16, 4  ;;  %v574_v21 = vrot.slane %v571_v17, 4  ;;  %v552_v31 = vadd.f32 %v549_v26, %v523_v28  ;;  %v582_v32 = vadd.f32 %v573_v16, %v553_v30 }
 0x143   : > { %v576_v25 = vsel %vm372_vm7, %v574_v21, %v575_v20  ;;  %v639_v40 = vrot.slane %v582_v32, %v630_v34  ;;  %v602_v45 = vrot.slane %v582_v32, %v593_v36  ;;  %v713_v0 = vrot.slane %v582_v32, %v704_v38 }
 0x144   : > { %v578_v29 = vsel %vm577_vm15, %v571_v17, %v576_v25  ;;  %v676_v48 = vrot.slane %v582_v32, %v667_v39 }
 0x145   : > { %v581_v33 = vadd.f32 %v578_v29, %v552_v31  ;;  %v654_v49 = vrot.slane %v639_v40, %v630_v34  ;;  %v617_v58 = vrot.slane %v602_v45, %v593_v36  ;;  %v728_v5 = vrot.slane %v713_v0, %v704_v38 }
 0x146   : > { %v691_v8 = vrot.slane %v676_v48, %v667_v39 }
 0x147   : > { %v631_v41 = vrot.slane %v581_v33, %v630_v34  ;;  %v594_v42 = vrot.slane %v581_v33, %v593_v36  ;;  %v635_v43 = vrot.slane %v581_v33, %v634_v35  ;;  %v598_v44 = vrot.slane %v581_v33, %v597_v37 }
 0x148   : > { %v668_v55 = vrot.slane %v581_v33, %v667_v39  ;;  %v672_v59 = vrot.slane %v581_v33, %v671_v46  ;;  %v705_v62 = vrot.slane %v581_v33, %v704_v38  ;;  %v709_v63 = vrot.slane %v581_v33, %v708_v47 }
 0x149   : > { %v646_v51 = vrot.slane %v631_v41, %v630_v34  ;;  %v609_v53 = vrot.slane %v594_v42, %v593_v36  ;;  %v650_v56 = vrot.slane %v635_v43, %v630_v34  ;;  %v613_v57 = vrot.slane %v598_v44, %v593_v36 }
 0x14a   : > { %v683_v4 = vrot.slane %v668_v55, %v667_v39  ;;  %v687_v7 = vrot.slane %v672_v59, %v667_v39  ;;  %v720_v11 = vrot.slane %v705_v62, %v704_v38  ;;  %v724_v12 = vrot.slane %v709_v63, %v704_v38 }
 0x151   : > { %v626_v50 = vpop.permute.xlu1 %625  ;;  %v587_v54 = vpop.permute.xlu0 %586 }
 0x152   : > { %v655_v60 = vmul.f32 %v646_v51, %v626_v50  ;;  %v618_v61 = vmul.f32 %v609_v53, %v587_v54  ;;  %v656_v1 = vmul.f32 %v650_v56, %v626_v50  ;;  %v657_v2 = vmul.f32 %v654_v49, %v626_v50 }
 0x153   : > { %v619_v3 = vmul.f32 %v613_v57, %v587_v54  ;;  %v620_v52 = vmul.f32 %v617_v58, %v587_v54 }
 0x154   : > { %v658_v10 = vadd.f32 %v655_v60, %v618_v61 }
 0x155   : > { %v659_v14 = vadd.f32 %v656_v1, %v619_v3  ;;  %v660_v15 = vadd.f32 %v657_v2, %v620_v52 }
 0x156   : > { %v700_v6 = vpop.permute.xlu1 %699  ;;  %v663_v9 = vpop.permute.xlu0 %662 }
 0x157   : > { %v692_v13 = vmul.f32 %v683_v4, %v663_v9  ;;  %v693_v16 = vmul.f32 %v687_v7, %v663_v9  ;;  %v694_v17 = vmul.f32 %v691_v8, %v663_v9  ;;  %v729_v18 = vmul.f32 %v720_v11, %v700_v6 }
 0x158   : > { %v730_v20 = vmul.f32 %v724_v12, %v700_v6  ;;  %v731_v21 = vmul.f32 %v728_v5, %v700_v6 }
 0x159   : > { %v695_v19 = vadd.f32 %v692_v13, %v658_v10  ;;  %v696_v22 = vadd.f32 %v693_v16, %v659_v14  ;;  %v697_v23 = vadd.f32 %v694_v17, %v660_v15 }
 0x15b   : > { %v739_v24 = vpop.permute.xlu1 %738  ;;  %v732_v25 = vadd.f32 %v729_v18, %v695_v19  ;;  %v733_v26 = vadd.f32 %v730_v20, %v696_v22  ;;  %v734_v27 = vadd.f32 %v731_v21, %v697_v23 }
 0x15d   : > { %v741_v28 = vadd.f32 %v739_v24, %v732_v25  ;;  %v742_v29 = vadd.f32 %v739_v24, %v733_v26  ;;  %v743_v30 = vadd.f32 %v739_v24, %v734_v27 }
 0x15f   : > { %v832_v31 = vmul.f32 -1.442695, %v741_v28  ;;  %v833_v32 = vmul.f32 -1.442695, %v742_v29  ;;  %v834_v33 = vmul.f32 -1.442695, %v743_v30 }
 0x161   : > { %884 = vpow2.f32 %v832_v31 }
 0x162   : > { %886 = vpow2.f32 %v833_v32 }
 0x163   : > { %888 = vpow2.f32 %v834_v33 }
 0x16b   : > { %v885_v34 = vpop.eup %884 }
 0x16c   : > { %v887_v35 = vpop.eup %886  ;;  %v753_v36 = vadd.f32 1.0, %v885_v34 }
 0x16d   : > { %v889_v37 = vpop.eup %888  ;;  %v754_v38 = vadd.f32 1.0, %v887_v35 }
 0x16e   : > { %v755_v39 = vadd.f32 1.0, %v889_v37  ;;  %890 = vrcp.f32 %v753_v36 }
 0x16f   : > { %892 = vrcp.f32 %v754_v38 }
 0x170   : > { %894 = vrcp.f32 %v755_v39 }
 0x178   : > { %v891_v40 = vpop.eup %890 }
 0x179   : > { %v893_v41 = vpop.eup %892  ;;  %v762_v42 = vmul.f32 %v891_v40, %v741_v28 }
 0x17a   : > { %v895_v43 = vpop.eup %894  ;;  %v763_v44 = vmul.f32 %v893_v41, %v742_v29 }
 0x17b   : > { %v764_v45 = vmul.f32 %v895_v43, %v743_v30  ;;  %765 = vst [vmem:[%s197_s23] sm:$0xff] %v762_v42 }
 0x17c   : > { %766 = vst [vmem:[%s197_s23 + $0x8] sm:$0xff] %v763_v44 }
 0x17d   : > { %768 = vst.msk [vmem:[%s197_s23 + $0x10] sm:$0xff] %vm767_vm0, %v764_v45 }
 0x17e PF: > { %s14_s15 = sadd.s32 1, %s902_s15  }
 0x17f   : > { %p11_p4 = scmp.ge.s32.totalorder %s14_s15, 4  }
 0x181   :  { %13 = sbr.rel (!%p11_p4) target bundleno = 1 (0x1), region = 66 }

</bundles_post_ra>
